<compile_context>
chip_gen: v5e
topology: v5e:2x2
jax: 0.10.0
libtpu: 0.0.40
codegen_flags: <defaults>
</compile_context>

<pallas_src>
from functools import partial

import jax
import jax.numpy as jnp
from jax import lax
from jax.experimental import pallas as pl
from jax.experimental.pallas import tpu as pltpu


def _round_up(x, m):
    return ((x + m - 1) // m) * m


def _vmem_budget_bytes():
    """Per-generation VMEM budget with ~25% headroom (48 MiB v7x, 96 MiB v5e/v6e)."""
    cap = 64 * 1024 * 1024  # conservative default (v7x-sized) if query unavailable
    try:
        cap = int(pltpu.get_tpu_info().vmem_capacity_bytes)
    except Exception:
        pass
    return max(32 * 1024 * 1024, min(96 * 1024 * 1024, (cap * 3) // 4))


def _matmul_bias_kernel_single(x_ref, w_ref, b_ref, o_ref):
    """Whole-K in one step: o = x @ w.T + bias (bf16 operands, f32 accumulate)."""
    # TODO(synk): dump bundles and confirm the trans_b contraction lowers without a
    # per-tile vxpose; if it does, pre-transpose the weight once (amortized).
    acc = lax.dot_general(
        x_ref[...],
        w_ref[...],
        dimension_numbers=(((1,), (1,)), ((), ())),
        preferred_element_type=jnp.float32,
    )
    o_ref[...] = (acc + b_ref[...]).astype(o_ref.dtype)


def _matmul_bias_kernel_acc(x_ref, w_ref, b_ref, o_ref, acc_ref):
    """Multi-K path: f32 accumulator across grid axis 2, bias folded in at the end."""
    @pl.when(pl.program_id(2) == 0)
    def _():
        acc_ref[...] = jnp.zeros_like(acc_ref)

    acc_ref[...] += lax.dot_general(
        x_ref[...],
        w_ref[...],
        dimension_numbers=(((1,), (1,)), ((), ())),
        preferred_element_type=jnp.float32,
    )

    @pl.when(pl.program_id(2) == pl.num_programs(2) - 1)
    def _():
        o_ref[...] = (acc_ref[...] + b_ref[...]).astype(o_ref.dtype)


def _linear_bias(x, w, bias, *, out_dtype, tm_max=None, tn_max=1024, tk_max=2048):
    """x: (M, K) bf16, w: (N, K) bf16 (PyTorch-Linear layout), bias: (N,) f32.
    Returns (M, N) = x @ w.T + bias in out_dtype. Weight is never padded/copied."""
    M, K = x.shape
    N, K2 = w.shape
    assert K == K2, f"contraction mismatch: {K} vs {K2}"

    budget = _vmem_budget_bytes()
    if tm_max is None:
        tm_max = 1024 if budget >= 64 * 1024 * 1024 else 512

    # --- K tiling: prefer whole-K single step (no accumulator, fewest grid steps).
    if K <= tk_max:
        tk = K
    else:
        tk = 0
        start = tk_max - (tk_max % 128)
        for cand in range(start, 127, -128):
            if K % cand == 0:
                tk = cand
                break
        if tk == 0:
            # Rare ragged-K fallback (K > tk_max and not a multiple of 128):
            # pad K with zeros (costs one weight copy; never hit for real models).
            tk = tk_max
            Kp = _round_up(K, tk)
            x = jnp.pad(x, ((0, 0), (0, Kp - K)))
            w = jnp.pad(w, ((0, 0), (0, Kp - K)))
            K = Kp
    k_tiles = K // tk

    # --- N (vocab) tiling: multiples of 256 (v6e/v7x MXU is 2x 256x256).
    tn = min(tn_max, _round_up(N, 256))
    n_tiles = pl.cdiv(N, tn)  # last tile may be ragged -> masked reads/writes

    # --- M tiling: balanced tiles (16-aligned for bf16 sublane packing).
    m_tiles = pl.cdiv(M, tm_max)
    tm = _round_up(pl.cdiv(M, m_tiles), 16)
    Mp = m_tiles * tm
    if Mp != M:
        x = jnp.pad(x, ((0, Mp - M), (0, 0)))  # cheap: M*K, not V*d

    # Bias padded to a tile multiple (tiny: O(V) f32) so bias reads are in-bounds.
    nb = n_tiles * tn
    bias2d = jnp.pad(bias.astype(jnp.float32), (0, nb - N)).reshape(1, nb)

    if k_tiles == 1:
        grid = (n_tiles, m_tiles)
        kernel = _matmul_bias_kernel_single
        in_specs = [
            pl.BlockSpec((tm, tk), lambda j, i: (i, 0)),   # activations
            pl.BlockSpec((tn, tk), lambda j, i: (j, 0)),   # weight, (N, K) layout
            pl.BlockSpec((1, tn), lambda j, i: (0, j)),    # bias row
        ]
        out_specs = pl.BlockSpec((tm, tn), lambda j, i: (i, j))
        scratch = []
        dims = ("parallel", "parallel")
    else:
        grid = (n_tiles, m_tiles, k_tiles)
        kernel = _matmul_bias_kernel_acc
        in_specs = [
            pl.BlockSpec((tm, tk), lambda j, i, k: (i, k)),
            pl.BlockSpec((tn, tk), lambda j, i, k: (j, k)),
            pl.BlockSpec((1, tn), lambda j, i, k: (0, j)),
        ]
        out_specs = pl.BlockSpec((tm, tn), lambda j, i, k: (i, j))
        scratch = [pltpu.VMEM((tm, tn), jnp.float32)]
        dims = ("parallel", "parallel", "arbitrary")

    out = pl.pallas_call(
        kernel,
        out_shape=jax.ShapeDtypeStruct((Mp, N), out_dtype),
        grid_spec=pltpu.PrefetchScalarGridSpec(
            num_scalar_prefetch=0,
            grid=grid,
            in_specs=in_specs,
            out_specs=out_specs,
            scratch_shapes=scratch,
        ),
        compiler_params=pltpu.CompilerParams(
            dimension_semantics=dims,
            vmem_limit_bytes=budget,
        ),
    )(x, w, bias2d)

    if Mp != M:
        out = out[:M]
    return out


@partial(jax.jit, static_argnames=("logits_dtype",))
def split_linear_forward(hidden_states, base_weight, train_weight, tune_ids, bias=None,
                         *, logits_dtype=None):
    """
    hidden_states: (B, L, d)
    base_weight:   (V, d)   frozen rows
    train_weight:  (T, d)   trainable rows replacing columns `tune_ids` of the logits
    tune_ids:      (T,) int32 (assumed unique, as in the PyTorch module)
    bias:          (V,) or None
    logits_dtype:  optional output dtype (e.g. jnp.bfloat16 to halve logits HBM traffic)
    returns:       (B, L, V)
    """
    B, L, d = hidden_states.shape
    V = base_weight.shape[0]
    out_dtype = hidden_states.dtype if logits_dtype is None else logits_dtype

    # bf16 operands, f32 accumulation in the kernel.
    x = hidden_states.reshape(B * L, d).astype(jnp.bfloat16)

    # Row-scatter the trainable rows into the weight (fused with the bf16 cast:
    # one pass over V*d reading f32, writing bf16) instead of column-scattering
    # the (M, V) logits.
    # TODO(synk): in a real serving/training loop, hoist/cache w_eff across steps
    # (it only changes when train_weight changes) and wrap it in a custom_vjp so
    # gradients flow only to the train_weight rows.
    w_eff = base_weight.astype(jnp.bfloat16).at[tune_ids].set(
        train_weight.astype(jnp.bfloat16))

    if bias is None:
        bias = jnp.zeros((V,), dtype=jnp.float32)

    logits = _linear_bias(x, w_eff, bias, out_dtype=out_dtype)
    return logits.reshape(B, L, V)


def _reference(hidden_states, base_weight, train_weight, tune_ids, bias):
    """PyTorch-order reference (two matmuls + column scatter) with bf16-rounded
    operands so the comparison against the bf16-operand kernel is tight."""
    hp = jax.lax.Precision.HIGHEST
    x = hidden_states.astype(jnp.bfloat16).astype(jnp.float32)
    bw = base_weight.astype(jnp.bfloat16).astype(jnp.float32)
    tw = train_weight.astype(jnp.bfloat16).astype(jnp.float32)
    ref = jnp.einsum("bld,vd->blv", x, bw, precision=hp)
    ref_t = jnp.einsum("bld,td->blt", x, tw, precision=hp)
    ref = ref.at[..., tune_ids].set(ref_t)
    if bias is not None:
        ref = ref + bias.astype(jnp.float32)
    return ref


if __name__ == "__main__":
    key = jax.random.PRNGKey(0)
    dtype = jnp.float32

    # --- case 1: aligned small shapes (single-K, single-N-tile path) ----------
    B, L, d, V, T = 2, 8, 128, 256, 64
    k_h, k_bw, k_tw, k_b, k_ids = jax.random.split(key, 5)
    hidden_states = jax.random.normal(k_h, (B, L, d), dtype=dtype)
    base_weight = jax.random.normal(k_bw, (V, d), dtype=dtype) * 0.02
    bias = jax.random.normal(k_b, (V,), dtype=dtype) * 0.01
    tune_ids = jax.random.permutation(k_ids, V)[:T].astype(jnp.int32)
    train_weight = base_weight[tune_ids] + 0.1 * jax.random.normal(k_tw, (T, d), dtype=dtype)

    out = split_linear_forward(hidden_states, base_weight, train_weight, tune_ids, bias)
    out = jax.block_until_ready(out)
    ref = _reference(hidden_states, base_weight, train_weight, tune_ids, bias)
    assert out.shape == (B, L, V)
    assert jnp.allclose(out, ref, atol=2e-3, rtol=2e-3)

    # --- case 2: ragged M/K/V, no bias (exercises masked last-tile handling) --
    B2, L2, d2, V2, T2 = 1, 5, 96, 200, 32
    k_h2, k_bw2, k_tw2, k_ids2 = jax.random.split(jax.random.PRNGKey(1), 4)
    hs2 = jax.random.normal(k_h2, (B2, L2, d2), dtype=dtype)
    bw2 = jax.random.normal(k_bw2, (V2, d2), dtype=dtype) * 0.02
    ids2 = jax.random.permutation(k_ids2, V2)[:T2].astype(jnp.int32)
    tw2 = bw2[ids2] + 0.1 * jax.random.normal(k_tw2, (T2, d2), dtype=dtype)

    out2 = jax.block_until_ready(split_linear_forward(hs2, bw2, tw2, ids2, None))
    ref2 = _reference(hs2, bw2, tw2, ids2, None)
    assert out2.shape == (B2, L2, V2)
    assert jnp.allclose(out2, ref2, atol=2e-3, rtol=2e-3)

    # --- case 3: multi-K accumulator path + multiple/ragged vocab & M tiles ----
    M3, K3, V3 = 160, 512, 640
    k_x3, k_w3, k_b3 = jax.random.split(jax.random.PRNGKey(2), 3)
    x3 = jax.random.normal(k_x3, (M3, K3), dtype=dtype)
    w3 = jax.random.normal(k_w3, (V3, K3), dtype=dtype) * 0.05
    b3 = jax.random.normal(k_b3, (V3,), dtype=dtype) * 0.01
    out3 = _linear_bias(x3.astype(jnp.bfloat16), w3.astype(jnp.bfloat16), b3,
                        out_dtype=jnp.float32, tm_max=64, tn_max=256, tk_max=256)
    out3 = jax.block_until_ready(out3)
    xr = x3.astype(jnp.bfloat16).astype(jnp.float32)
    wr = w3.astype(jnp.bfloat16).astype(jnp.float32)
    ref3 = jnp.einsum("mk,vk->mv", xr, wr, precision=jax.lax.Precision.HIGHEST) + b3
    assert out3.shape == (M3, V3)
    assert jnp.allclose(out3, ref3, atol=5e-3, rtol=5e-3)

    print("KERNEL_OK")
</pallas_src>

<mosaic_0001>
module attributes {stable_mosaic.version = 11 : i64} {
  func.func @_matmul_bias_kernel_single(%arg0: i32, %arg1: i32, %arg2: memref<16x128xbf16, #tpu.memory_space<vmem>>, %arg3: memref<256x128xbf16, #tpu.memory_space<vmem>>, %arg4: memref<1x256xf32, #tpu.memory_space<vmem>>, %arg5: memref<16x256xf32, #tpu.memory_space<vmem>>) attributes {dimension_semantics = [#tpu.dimension_semantics<parallel>, #tpu.dimension_semantics<parallel>], iteration_bounds = array<i64: 1, 1>, scalar_prefetch = 0 : i64, scratch_operands = 0 : i64, tpu.core_type = #tpu.core_type<tc>, window_params = [{transform_indices = @transform_0, window_bounds = array<i64: 16, 128>}, {transform_indices = @transform_1, window_bounds = array<i64: 256, 128>}, {transform_indices = @transform_2, window_bounds = array<i64: 1, 256>}, {transform_indices = @transform_3, window_bounds = array<i64: 16, 256>}]} {
    %c0 = arith.constant 0 : index
    %c0_0 = arith.constant 0 : index
    %0 = vector.load %arg2[%c0, %c0_0] : memref<16x128xbf16, #tpu.memory_space<vmem>>, vector<16x128xbf16>
    %c0_1 = arith.constant 0 : index
    %c0_2 = arith.constant 0 : index
    %1 = vector.load %arg3[%c0_1, %c0_2] : memref<256x128xbf16, #tpu.memory_space<vmem>>, vector<256x128xbf16>
    %cst = arith.constant dense<0.000000e+00> : vector<16x256xf32>
    %2 = tpu.matmul %0, %1, %cst {dimension_numbers = #tpu.dot_dimension_numbers<[1], [1], [0], [0], [0, 0, 1, 0], [], []>} : vector<16x128xbf16>, vector<256x128xbf16>, vector<16x256xf32> -> vector<16x256xf32>
    %c0_3 = arith.constant 0 : index
    %c0_4 = arith.constant 0 : index
    %3 = vector.load %arg4[%c0_3, %c0_4] : memref<1x256xf32, #tpu.memory_space<vmem>>, vector<1x256xf32>
    %4 = vector.broadcast %3 : vector<1x256xf32> to vector<16x256xf32>
    %5 = arith.addf %2, %4 : vector<16x256xf32>
    %c0_5 = arith.constant 0 : index
    %c0_6 = arith.constant 0 : index
    %6 = vector.load %arg5[%c0_5, %c0_6] : memref<16x256xf32, #tpu.memory_space<vmem>>, vector<16x256xf32>
    tpu.vector_store %arg5[%c0_5, %c0_6], %5 {strides = array<i32>} : memref<16x256xf32, #tpu.memory_space<vmem>>, vector<16x256xf32>,
    return
  }
  func.func @transform_0(%arg0: i32, %arg1: i32) -> (i32, i32) {
    %c0_i32 = arith.constant 0 : i32
    %c0_i32_0 = arith.constant 0 : i32
    return %arg1, %c0_i32 : i32, i32
  }
  func.func @transform_1(%arg0: i32, %arg1: i32) -> (i32, i32) {
    %c0_i32 = arith.constant 0 : i32
    %c0_i32_0 = arith.constant 0 : i32
    return %arg0, %c0_i32 : i32, i32
  }
  func.func @transform_2(%arg0: i32, %arg1: i32) -> (i32, i32) {
    %c0_i32 = arith.constant 0 : i32
    %c0_i32_0 = arith.constant 0 : i32
    return %c0_i32, %arg0 : i32, i32
  }
  func.func @transform_3(%arg0: i32, %arg1: i32) -> (i32, i32) {
    %c0_i32 = arith.constant 0 : i32
    return %arg1, %arg0 : i32, i32
  }
}

</mosaic_0001>

<bundles_post_ra>
// kernel: split_linear_forward.1
= control target key start
LH: loop header
LB: loop body
LE: loop exit
PB: predicated region body
PF: predicated region fallthrough
CT: control target
= control target key end

     0   :  { %s401_s0 = inlined_call_operand.vmem [shape: bf16[16,128], index: 0, kind: input, shape index: {}]   ;;  %s402_s1 = inlined_call_operand.vmem [shape: bf16[256,128], index: 1, kind: input, shape index: {}]   ;;  %s403_s2 = inlined_call_operand.vmem [shape: f32[1,256], index: 2, kind: input, shape index: {}]   ;;  %s404_s3 = inlined_call_operand.hbm [shape: f32[16,256], index: 3, kind: output, shape index: {}]  }
   0x1   :  { %v283_v0 = vld [vmem:[%s402_s1 + $0x38] sm:$0xff] }
   0x2   :  { %v291_v1 = vld [vmem:[%s402_s1 + $0x78] sm:$0xff]  ;;  %157 = vmatpush.bf16.xpose.msra.mxu0 %v283_v0 }
   0x3   :  { %171 = vmatpush.bf16.xpose.msra.mxu1 %v291_v1 }
   0x4   :  { %8 = vsyncpa [#allocation3], 0  ;;  %v282_v2 = vld [vmem:[%s402_s1 + $0x30] sm:$0xff]  ;;  %v281_v4 = vld [vmem:[%s402_s1 + $0x28] sm:$0xff]  ;;  %s323_s24 = smov 16  }
   0x5   :  { %v290_v3 = vld [vmem:[%s402_s1 + $0x70] sm:$0xff]  ;;  %v289_v5 = vld [vmem:[%s402_s1 + $0x68] sm:$0xff]  ;;  %v280_v6 = vld [vmem:[%s402_s1 + $0x20] sm:$0xff] }
   0x6   :  { %v288_v7 = vld [vmem:[%s402_s1 + $0x60] sm:$0xff]  ;;  %v279_v8 = vld [vmem:[%s402_s1 + $0x18] sm:$0xff]  ;;  %v278_v10 = vld [vmem:[%s402_s1 + $0x10] sm:$0xff] }
   0x7   :  { %v287_v9 = vld [vmem:[%s402_s1 + $0x58] sm:$0xff]  ;;  %v286_v11 = vld [vmem:[%s402_s1 + $0x50] sm:$0xff]  ;;  %v277_v12 = vld [vmem:[%s402_s1 + $0x8] sm:$0xff] }
   0x8   :  { %v285_v13 = vld [vmem:[%s402_s1 + $0x48] sm:$0xff]  ;;  %v276_v14 = vld [vmem:[%s402_s1] sm:$0xff] }
   0x9   :  { %v284_v15 = vld [vmem:[%s402_s1 + $0x40] sm:$0xff]  ;;  %s321_s1 = smov [#allocation2]  }
   0xa   :  { %158 = vmatpush.bf16.xpose.msra.mxu0 %v282_v2  ;;  %v275_v16 = vld [vmem:[%s401_s0] sm:$0xff]  ;;  %s193_s21 = sshll.u32 %s321_s1, 4  ;;  %s195_s0 = sshll.u32 %s404_s3, 4  ;;  %s194_s21 = int_to_ptr.vmem [resolvable:$true] %s193_s21  ;;  %s196_s0 = int_to_ptr.hbm [resolvable:$true] %s195_s0 }
   0xb   :  { %172 = vmatpush.bf16.xpose.msra.mxu1 %v290_v3  ;;  %v49_v17 = vld [vmem:[%s403_s2] sm:$0x3]  ;;  %s322_s2 = smov 256  }
   0xc   :  { %v51_v18 = vperm.slane %v49_v17, 0  ;;  %v52_v19 = vperm.slane %v49_v17, 1 }
  0x12   :  { %159 = vmatpush.bf16.xpose.msra.mxu0 %v281_v4 }
  0x13   :  { %173 = vmatpush.bf16.xpose.msra.mxu1 %v289_v5 }
  0x1a   :  { %160 = vmatpush.bf16.xpose.msra.mxu0 %v280_v6 }
  0x1b   :  { %174 = vmatpush.bf16.xpose.msra.mxu1 %v288_v7 }
  0x22   :  { %161 = vmatpush.bf16.xpose.msra.mxu0 %v279_v8 }
  0x23   :  { %175 = vmatpush.bf16.xpose.msra.mxu1 %v287_v9 }
  0x2a   :  { %162 = vmatpush.bf16.xpose.msra.mxu0 %v278_v10 }
  0x2b   :  { %176 = vmatpush.bf16.xpose.msra.mxu1 %v286_v11 }
  0x32   :  { %163 = vmatpush.bf16.xpose.msra.mxu0 %v277_v12 }
  0x33   :  { %177 = vmatpush.bf16.xpose.msra.mxu1 %v285_v13 }
  0x3a   :  { %164 = vmatpush.bf16.xpose.msra.mxu0 %v276_v14 }
  0x3b   :  { %178 = vmatpush.bf16.xpose.msra.mxu1 %v284_v15 }
  0x41   :  { %165 = vmatmul.bf16.vlgmr.msra.gmra.mxu0 %v275_v16 }
  0x42   :  { %179 = vmatmul.bf16.vlgmr.msra.gmra.mxu1 %v275_v16 }
  0xbe   :  { %v166_v20 = vpop.f32.mrf.mxu0 }
  0xbf   :  { %v180_v21 = vpop.f32.mrf.mxu1  ;;  %v167_v22 = vadd.f32 %v166_v20, %v51_v18 }
  0xc0   :  { %v181_v23 = vadd.f32 %v180_v21, %v52_v19 }
  0xc1   :  { %185 = vst [vmem:[#allocation2] sm:$0xff] %v167_v22 }
  0xc2   :  { %186 = vst [vmem:[#allocation2 + $0x8] sm:$0xff] %v181_v23 }
  0xc6   :  { %v168_v24 = vpop.f32.mrf.mxu0 }
  0xc7   :  { %v182_v25 = vpop.f32.mrf.mxu1  ;;  %v169_v26 = vadd.f32 %v168_v24, %v51_v18 }
  0xc8   :  { %v183_v27 = vadd.f32 %v182_v25, %v52_v19 }
  0xc9   :  { %187 = vst [vmem:[#allocation2 + $0x10] sm:$0xff] %v169_v26 }
  0xca   :  { %188 = vst [vmem:[#allocation2 + $0x18] sm:$0xff] %v183_v27 }
  0xcb   :  { %201 = dma.vmem_to_hbm [thread:$0]  %s194_s21, 512, %s196_s0, [#allocation3], %s322_s2, %s322_s2, %s323_s24  }
  0xcc   :  { %319 = dma.done.wait [#allocation3], 512  }
  0xcd   :  { %320 = vsyncadd [#allocation3], 4294966784 }
  0xce   :  { %206 = vsyncpa [#allocation3], 1 }

</bundles_post_ra>
